<compile_context>
chip_gen: v6e
topology: v6e:2x2x1
jax: 0.10.0
libtpu: 0.0.40
codegen_flags: <defaults>
</compile_context>

<pallas_src>
import math
import functools

import jax
import jax.numpy as jnp
from jax import lax
from jax.experimental import pallas as pl
from jax.experimental.pallas import tpu as pltpu

NEG_INF = -1e32          # python float -> becomes a jaxpr literal (no captured consts)
LN_EPS = 1e-5
HEAD_PAD = 128           # pad the 1-wide prediction column to a full lane width
_PAR1 = pltpu.CompilerParams(dimension_semantics=("parallel",))


# --------------------------------------------------------------------------- helpers

def _round_up(x, m):
    return ((x + m - 1) // m) * m


def _row_plan(m, target_tm=512):
    """Row tiling for (M, *) activations: 16-aligned (bf16-safe), up to target_tm."""
    m16 = _round_up(m, 16)
    tm = min(target_tm, m16)
    return tm, _round_up(m16, tm)


def _pad_rows(x, m_pad):
    m = x.shape[0]
    return x if m == m_pad else jnp.pad(x, ((0, m_pad - m), (0, 0)))


def _unpad_rows(x, m):
    return x if x.shape[0] == m else x[:m]


def _wt_bf16(w):
    """torch-layout (out, in) weight -> (in, out) bf16 for the MXU (done once)."""
    return jnp.asarray(w, jnp.float32).T.astype(jnp.bfloat16)


def _row_f32(b):
    return jnp.asarray(b, jnp.float32).reshape(1, -1)


def _mm_cost(m, k, n, n_mats=1, transcendentals=0):
    return pl.CostEstimate(
        flops=2 * m * k * n * n_mats,
        transcendentals=transcendentals,
        bytes_accessed=4 * m * (k + n) * n_mats + 2 * k * n * n_mats)


# --------------------------------------------------------------------------- kernels

def _qkv_kernel(x_ref, y_ref, wk_ref, bk_ref, wv_ref, bv_ref, kq_ref, vv_ref):
    # kq_same=1: q and k share k_linear applied to x; v = v_linear(y).
    # Bias add in f32, store as bf16 (both consumers feed the MXU in bf16 anyway).
    kq = jnp.dot(x_ref[...].astype(jnp.bfloat16), wk_ref[...],
                 preferred_element_type=jnp.float32) + bk_ref[...]
    vv = jnp.dot(y_ref[...].astype(jnp.bfloat16), wv_ref[...],
                 preferred_element_type=jnp.float32) + bv_ref[...]
    kq_ref[...] = kq.astype(jnp.bfloat16)
    vv_ref[...] = vv.astype(jnp.bfloat16)


def _matmul_add_ln_kernel(a_ref, w_ref, b_ref, res_ref, g_ref, bt_ref, o_ref):
    # (a @ W + b) -> +residual -> LayerNorm (torch: biased var, eps inside sqrt).
    y = jnp.dot(a_ref[...].astype(jnp.bfloat16), w_ref[...],
                preferred_element_type=jnp.float32) + b_ref[...]
    z = res_ref[...] + y
    mu = jnp.mean(z, axis=-1, keepdims=True)
    var = jnp.mean(jnp.square(z - mu), axis=-1, keepdims=True)
    o_ref[...] = (z - mu) * lax.rsqrt(var + LN_EPS) * g_ref[...] + bt_ref[...]


def _ffn_add_ln_kernel(x_ref, w1_ref, b1_ref, w2_ref, b2_ref, g_ref, bt_ref, o_ref):
    x = x_ref[...]
    h = jnp.dot(x.astype(jnp.bfloat16), w1_ref[...],
                preferred_element_type=jnp.float32) + b1_ref[...]
    h = jnp.maximum(h, 0.0)                                   # ReLU
    y = jnp.dot(h.astype(jnp.bfloat16), w2_ref[...],
                preferred_element_type=jnp.float32) + b2_ref[...]
    z = x + y                                                 # residual
    mu = jnp.mean(z, axis=-1, keepdims=True)
    var = jnp.mean(jnp.square(z - mu), axis=-1, keepdims=True)
    o_ref[...] = (z - mu) * lax.rsqrt(var + LN_EPS) * g_ref[...] + bt_ref[...]


def _head_kernel(x_ref, q_ref, w1x_ref, w1q_ref, b1_ref, w2_ref, b2_ref,
                 w3_ref, b3_ref, o_ref):
    # Fused concat: cat([x, q]) @ W1 == x @ W1[:D] + q @ W1[D:]
    h = (jnp.dot(x_ref[...].astype(jnp.bfloat16), w1x_ref[...],
                 preferred_element_type=jnp.float32)
         + jnp.dot(q_ref[...].astype(jnp.bfloat16), w1q_ref[...],
                   preferred_element_type=jnp.float32)
         + b1_ref[...])
    h = jnp.maximum(h, 0.0)
    h = jnp.dot(h.astype(jnp.bfloat16), w2_ref[...],
                preferred_element_type=jnp.float32) + b2_ref[...]
    h = jnp.maximum(h, 0.0)
    o = jnp.dot(h.astype(jnp.bfloat16), w3_ref[...],
                preferred_element_type=jnp.float32) + b3_ref[...]
    o_ref[...] = jax.nn.sigmoid(o)


def _sparse_attn_kernel(kq_ref, vv_ref, o_ref, *w_refs, n_heads, k_index, scale):
    w_ref = w_refs[0] if w_refs else None
    kq = kq_ref[...]                       # (L, D) bf16; q == k (kq_same=1)
    vv = vv_ref[...]                       # (L, D) bf16
    L, D = kq.shape
    dk = D // n_heads
    kf = float(k_index)

    # masks built once per grid step, shared across all heads
    row = lax.broadcasted_iota(jnp.int32, (L, L), 0)
    col = lax.broadcasted_iota(jnp.int32, (L, L), 1)
    allowed = col < row                    # mask==0 -> -1e32 ; strictly-past only
    is_row0 = row == 0
    sparse_rows = row > k_index

    for h in range(n_heads):               # static head loop inside one fat grid step
        kh = kq[:, h * dk:(h + 1) * dk]                         # (L, dk) bf16
        vh = vv[:, h * dk:(h + 1) * dk]
        qh = kh * scale                                         # scale folded into q

        # q @ k^T without materializing a transpose (contract last dims, bf16 MXU)
        s = lax.dot_general(qh, kh, (((1,), (1,)), ((), ())),
                            preferred_element_type=jnp.float32)  # (L, L) f32
        s = jnp.where(allowed, s, NEG_INF)

        # softmax(dim=-1), f32, exact division (row 0 fully masked -> uniform)
        m1 = jnp.max(s, axis=-1, keepdims=True)
        e1 = jnp.exp(s - m1)
        p1 = e1 / jnp.sum(e1, axis=-1, keepdims=True)

        if k_index + 1 < L:
            # 'sparseattn': rows i > k_index keep entries >= the k_index-th largest
            # prob of the row (ties kept, exactly torch.sort+threshold), then
            # re-softmax over the *probabilities*.  Softmax is row-monotone, so the
            # threshold/selection are computed on the masked logits s (cheaper and
            # independent of the softmax above).  O(k*L^2), no (L,L,L) intermediate.
            work = s
            removed = jnp.zeros((L, 1), jnp.float32)
            thr = jnp.full((L, 1), NEG_INF, jnp.float32)
            for _ in range(k_index):
                cur = jnp.max(work, axis=-1, keepdims=True)
                cnt = jnp.sum((work == cur).astype(jnp.float32), axis=-1,
                              keepdims=True)
                thr = jnp.where(removed < kf, cur, thr)
                work = jnp.where(work == cur, NEG_INF, work)
                removed = removed + cnt
            keep = s >= thr
            s2 = jnp.where(keep, p1, NEG_INF)       # second softmax acts on probs
            m2 = jnp.max(s2, axis=-1, keepdims=True)
            e2 = jnp.exp(s2 - m2)
            p2 = e2 / jnp.sum(e2, axis=-1, keepdims=True)
            p = jnp.where(sparse_rows, p2, p1)
        else:
            p = p1

        p = jnp.where(is_row0, 0.0, p)     # zero_pad: first query row -> zeros

        if w_ref is not None:
            w_ref[h] = p                   # (L, L) attn weights for this head
        # per-head write bounds live ranges; no end-of-step concat
        o_ref[:, h * dk:(h + 1) * dk] = jnp.dot(
            p.astype(jnp.bfloat16), vh,
            preferred_element_type=jnp.float32).astype(jnp.bfloat16)


# --------------------------------------------------------------------------- wrappers

def qkv_proj(x, y, wk_t, bk, wv_t, bv):
    """k/q projection of x and v projection of y fused; bf16 outputs."""
    M, D = x.shape
    tm, m_pad = _row_plan(M)
    kq, vv = pl.pallas_call(
        _qkv_kernel,
        out_shape=(jax.ShapeDtypeStruct((m_pad, D), jnp.bfloat16),
                   jax.ShapeDtypeStruct((m_pad, D), jnp.bfloat16)),
        grid=(m_pad // tm,),
        in_specs=[pl.BlockSpec((tm, D), lambda i: (i, 0)),
                  pl.BlockSpec((tm, D), lambda i: (i, 0)),
                  pl.BlockSpec((D, D), lambda i: (0, 0)),
                  pl.BlockSpec((1, D), lambda i: (0, 0)),
                  pl.BlockSpec((D, D), lambda i: (0, 0)),
                  pl.BlockSpec((1, D), lambda i: (0, 0))],
        out_specs=(pl.BlockSpec((tm, D), lambda i: (i, 0)),
                   pl.BlockSpec((tm, D), lambda i: (i, 0))),
        compiler_params=_PAR1,
        cost_estimate=_mm_cost(m_pad, D, D, n_mats=2),
    )(_pad_rows(x, m_pad), _pad_rows(y, m_pad), wk_t, bk, wv_t, bv)
    return _unpad_rows(kq, M), _unpad_rows(vv, M)


def sparse_attention(kq, vv, *, n_heads, k_index, need_weights):
    """kq, vv: (B, L, D) head-packed bf16.  Returns (out bf16 (B,L,D), weights|None)."""
    B, L, D = kq.shape
    scale = 1.0 / math.sqrt(D // n_heads)

    out_shape = [jax.ShapeDtypeStruct((B, L, D), jnp.bfloat16)]
    out_specs = [pl.BlockSpec((None, L, D), lambda b: (b, 0, 0))]
    if need_weights:
        out_shape.append(jax.ShapeDtypeStruct((B, n_heads, L, L), jnp.float32))
        out_specs.append(pl.BlockSpec((None, n_heads, L, L), lambda b: (b, 0, 0, 0)))

    res = pl.pallas_call(
        functools.partial(_sparse_attn_kernel, n_heads=n_heads, k_index=k_index,
                          scale=scale),
        out_shape=tuple(out_shape),
        grid=(B,),
        in_specs=[pl.BlockSpec((None, L, D), lambda b: (b, 0, 0)),
                  pl.BlockSpec((None, L, D), lambda b: (b, 0, 0))],
        out_specs=tuple(out_specs),
        compiler_params=_PAR1,
    )(kq, vv)
    if need_weights:
        return res[0], res[1]
    out = res[0] if isinstance(res, (tuple, list)) else res
    return out, None


def proj_add_ln(a, w_t, b, residual, gamma, beta):
    """LayerNorm(residual + (a @ W + b)) in one pallas_call."""
    M, K = a.shape
    N = w_t.shape[1]
    tm, m_pad = _row_plan(M)
    return _unpad_rows(pl.pallas_call(
        _matmul_add_ln_kernel,
        out_shape=jax.ShapeDtypeStruct((m_pad, N), jnp.float32),
        grid=(m_pad // tm,),
        in_specs=[pl.BlockSpec((tm, K), lambda i: (i, 0)),
                  pl.BlockSpec((K, N), lambda i: (0, 0)),
                  pl.BlockSpec((1, N), lambda i: (0, 0)),
                  pl.BlockSpec((tm, N), lambda i: (i, 0)),
                  pl.BlockSpec((1, N), lambda i: (0, 0)),
                  pl.BlockSpec((1, N), lambda i: (0, 0))],
        out_specs=pl.BlockSpec((tm, N), lambda i: (i, 0)),
        compiler_params=_PAR1,
        cost_estimate=_mm_cost(m_pad, K, N),
    )(_pad_rows(a, m_pad), w_t, b, _pad_rows(residual, m_pad), gamma, beta), M)


def ffn_add_ln(x, w1_t, b1, w2_t, b2, gamma, beta):
    """LayerNorm(x + linear2(relu(linear1(x)))) in one pallas_call."""
    M, D = x.shape
    F = w1_t.shape[1]
    tm, m_pad = _row_plan(M)
    return _unpad_rows(pl.pallas_call(
        _ffn_add_ln_kernel,
        out_shape=jax.ShapeDtypeStruct((m_pad, D), jnp.float32),
        grid=(m_pad // tm,),
        in_specs=[pl.BlockSpec((tm, D), lambda i: (i, 0)),
                  pl.BlockSpec((D, F), lambda i: (0, 0)),
                  pl.BlockSpec((1, F), lambda i: (0, 0)),
                  pl.BlockSpec((F, D), lambda i: (0, 0)),
                  pl.BlockSpec((1, D), lambda i: (0, 0)),
                  pl.BlockSpec((1, D), lambda i: (0, 0)),
                  pl.BlockSpec((1, D), lambda i: (0, 0))],
        out_specs=pl.BlockSpec((tm, D), lambda i: (i, 0)),
        compiler_params=_PAR1,
        cost_estimate=_mm_cost(m_pad, D, F, n_mats=2),
    )(_pad_rows(x, m_pad), w1_t, b1, w2_t, b2, gamma, beta), M)


def prediction_head(x, q, w1x_t, w1q_t, b1, w2_t, b2, w3p, b3p):
    """sigmoid(L3(relu(L2(relu(x@W1a + q@W1b + b1))))) fused; the 1-wide output is
    padded to 128 lanes (unmasked stores), column 0 sliced off here."""
    M, D = x.shape
    F1 = w1x_t.shape[1]
    F2 = w2_t.shape[1]
    tm, m_pad = _row_plan(M)
    out = pl.pallas_call(
        _head_kernel,
        out_shape=jax.ShapeDtypeStruct((m_pad, HEAD_PAD), jnp.float32),
        grid=(m_pad // tm,),
        in_specs=[pl.BlockSpec((tm, D), lambda i: (i, 0)),
                  pl.BlockSpec((tm, D), lambda i: (i, 0)),
                  pl.BlockSpec((D, F1), lambda i: (0, 0)),
                  pl.BlockSpec((D, F1), lambda i: (0, 0)),
                  pl.BlockSpec((1, F1), lambda i: (0, 0)),
                  pl.BlockSpec((F1, F2), lambda i: (0, 0)),
                  pl.BlockSpec((1, F2), lambda i: (0, 0)),
                  pl.BlockSpec((F2, HEAD_PAD), lambda i: (0, 0)),
                  pl.BlockSpec((1, HEAD_PAD), lambda i: (0, 0))],
        out_specs=pl.BlockSpec((tm, HEAD_PAD), lambda i: (i, 0)),
        compiler_params=_PAR1,
        cost_estimate=_mm_cost(m_pad, 2 * D, F1, n_mats=3,
                               transcendentals=m_pad * HEAD_PAD),
    )(_pad_rows(x, m_pad), _pad_rows(q, m_pad), w1x_t, w1q_t, b1, w2_t, b2, w3p, b3p)
    return out[:M, 0]


# --------------------------------------------------------------------------- model glue

def make_cosine_pe(max_len, d_model):
    # CosinePositionalEmbedding: sin/cos entirely overwrite the 0.1*randn init
    position = jnp.arange(max_len, dtype=jnp.float32)[:, None]
    div_term = jnp.exp(jnp.arange(0, d_model, 2, dtype=jnp.float32)
                       * (-math.log(10000.0) / d_model))
    pe = jnp.zeros((max_len, d_model), dtype=jnp.float32)
    pe = pe.at[:, 0::2].set(jnp.sin(position * div_term))
    pe = pe.at[:, 1::2].set(jnp.cos(position * div_term))
    return pe


def transformer_layer_fwd(x, y, p, *, n_heads, k_index, need_weights):
    """One TransformerLayer (mask=0, zero_pad=True, apply_pos=True, kq_same=1)."""
    B, L, D = x.shape
    x2 = x.reshape(B * L, D)
    y2 = y.reshape(B * L, D)

    kq, vv = qkv_proj(x2, y2, p["k_w"], p["k_b"], p["v_w"], p["v_b"])

    attn_out, attn_w = sparse_attention(kq.reshape(B, L, D), vv.reshape(B, L, D),
                                        n_heads=n_heads, k_index=k_index,
                                        need_weights=need_weights)

    # out_proj + residual + LayerNorm1 fused
    x1 = proj_add_ln(attn_out.reshape(B * L, D), p["out_w"], p["out_b"],
                     x2, p["ln1_g"], p["ln1_b"])
    # FFN (linear1 -> ReLU -> linear2) + residual + LayerNorm2 fused
    xo = ffn_add_ln(x1, p["ff1_w"], p["ff1_b"], p["ff2_w"], p["ff2_b"],
                    p["ln2_g"], p["ln2_b"])
    return xo.reshape(B, L, D), attn_w


def init_params(key, *, n_question, n_pid, d_model, n_blocks, n_heads, d_ff,
                final_fc_dim, final_fc_dim2, seq_len):
    keys = iter(jax.random.split(key, 8 + 8 * n_blocks))

    def nrm(shape, scale=0.1):
        return (scale * jax.random.normal(next(keys), shape)).astype(jnp.float32)

    params = dict(
        q_embed=nrm((n_question, d_model)),
        qa_embed=nrm((2, d_model)),                 # separate_qa = False
        q_embed_diff=nrm((n_question + 1, d_model)),
        # NOTE: PyTorch reset() zero-inits difficult_param; nonzero here to exercise rasch path
        difficult_param=nrm((n_pid + 1, d_model), scale=0.05),
        pos_pe=make_cosine_pe(seq_len, d_model),
        out1_w=nrm((final_fc_dim, 2 * d_model)), out1_b=jnp.zeros((final_fc_dim,), jnp.float32),
        out2_w=nrm((final_fc_dim2, final_fc_dim)), out2_b=jnp.zeros((final_fc_dim2,), jnp.float32),
        out3_w=nrm((1, final_fc_dim2)), out3_b=jnp.zeros((1,), jnp.float32),
        blocks=[],
    )
    for _ in range(n_blocks):
        params["blocks"].append(dict(
            k_w=nrm((d_model, d_model)), k_b=jnp.zeros((d_model,), jnp.float32),
            v_w=nrm((d_model, d_model)), v_b=jnp.zeros((d_model,), jnp.float32),
            out_w=nrm((d_model, d_model)), out_b=jnp.zeros((d_model,), jnp.float32),
            ln1_g=jnp.ones((d_model,), jnp.float32), ln1_b=jnp.zeros((d_model,), jnp.float32),
            ff1_w=nrm((d_ff, d_model)), ff1_b=jnp.zeros((d_ff,), jnp.float32),
            ff2_w=nrm((d_model, d_ff)), ff2_b=jnp.zeros((d_model,), jnp.float32),
            ln2_g=jnp.ones((d_model,), jnp.float32), ln2_b=jnp.zeros((d_model,), jnp.float32),
        ))
    return params


def prepare_params(params):
    """One-time weight prep: transpose to (in,out), cast to bf16, (1,N) f32 biases.
    Avoids per-forward transpose/cast traffic in every wrapper."""
    D = params["q_embed"].shape[1]
    prep = dict(
        q_embed=params["q_embed"],
        qa_embed=params["qa_embed"],
        q_embed_diff=params["q_embed_diff"],
        difficult_param=params["difficult_param"],
        pos_pe=params["pos_pe"],
    )
    w1_t = _wt_bf16(params["out1_w"])                      # (2D, F1) bf16
    prep["out1_wx"] = w1_t[:D]                             # first D inputs: d_output
    prep["out1_wq"] = w1_t[D:]                             # last D inputs: q_embed_data
    prep["out1_b"] = _row_f32(params["out1_b"])
    prep["out2_w"] = _wt_bf16(params["out2_w"])
    prep["out2_b"] = _row_f32(params["out2_b"])
    F2 = params["out2_w"].shape[0]
    w3 = jnp.asarray(params["out3_w"], jnp.float32)        # (1, F2)
    prep["out3_w"] = (jnp.zeros((F2, HEAD_PAD), jnp.float32)
                      .at[:, 0].set(w3[0]).astype(jnp.bfloat16))
    prep["out3_b"] = (jnp.zeros((1, HEAD_PAD), jnp.float32)
                      .at[0, 0].set(jnp.asarray(params["out3_b"], jnp.float32)[0]))
    prep["blocks"] = []
    for blk in params["blocks"]:
        prep["blocks"].append(dict(
            k_w=_wt_bf16(blk["k_w"]), k_b=_row_f32(blk["k_b"]),
            v_w=_wt_bf16(blk["v_w"]), v_b=_row_f32(blk["v_b"]),
            out_w=_wt_bf16(blk["out_w"]), out_b=_row_f32(blk["out_b"]),
            ln1_g=_row_f32(blk["ln1_g"]), ln1_b=_row_f32(blk["ln1_b"]),
            ff1_w=_wt_bf16(blk["ff1_w"]), ff1_b=_row_f32(blk["ff1_b"]),
            ff2_w=_wt_bf16(blk["ff2_w"]), ff2_b=_row_f32(blk["ff2_b"]),
            ln2_g=_row_f32(blk["ln2_g"]), ln2_b=_row_f32(blk["ln2_b"]),
        ))
    return prep


def sparsekt_forward(prep, dcur, *, n_heads, k_index):
    """Reproduces sparseKT.forward (emb_type='qid_sparseattn', n_pid>0, eval mode).
    Returns (preds (B,L), attn_weights (B,H,L,L)) like the torch module (non-train path)."""
    q, c, r = dcur["qseqs"], dcur["cseqs"], dcur["rseqs"]
    qshft, cshft, rshft = dcur["shft_qseqs"], dcur["shft_cseqs"], dcur["shft_rseqs"]

    pid_data = jnp.concatenate([q[:, :1], qshft], axis=1)
    q_data = jnp.concatenate([c[:, :1], cshft], axis=1)
    target = jnp.concatenate([r[:, :1], rshft], axis=1)
    B, L = q_data.shape
    D = prep["q_embed"].shape[1]

    # ---- embedding lookups (glue) ----
    q_embed_data = prep["q_embed"][q_data]                         # (B,L,D)
    qa_embed_data = prep["qa_embed"][target] + q_embed_data        # separate_qa=False
    q_embed_diff = prep["q_embed_diff"][q_data]
    pid_embed = prep["difficult_param"][pid_data]
    q_embed_data = q_embed_data + pid_embed * q_embed_diff         # rasch term

    # ---- Architecture: cosine positional embedding (local copies only) ----
    pe = prep["pos_pe"][:L][None]                                  # (1,L,D)
    x = q_embed_data + pe
    y = qa_embed_data + pe

    attn_w = None
    n_blocks = len(prep["blocks"])
    for bi, blk in enumerate(prep["blocks"]):
        last = bi == n_blocks - 1
        x, w = transformer_layer_fwd(x, y, blk, n_heads=n_heads, k_index=k_index,
                                     need_weights=last)   # weights only kept for last block
        if last:
            attn_w = w

    # ---- prediction head: cat([d_output, q_embed_data (pre-position)], -1) fused
    preds = prediction_head(x.reshape(B * L, D), q_embed_data.reshape(B * L, D),
                            prep["out1_wx"], prep["out1_wq"], prep["out1_b"],
                            prep["out2_w"], prep["out2_b"],
                            prep["out3_w"], prep["out3_b"]).reshape(B, L)
    return preds, attn_w


# --------------------------------------------------------------------------- demo

if __name__ == "__main__":
    B, S = 2, 7                       # raw sequence length S; model length L = S + 1 = 8
    n_question, n_pid = 50, 50
    d_model, n_heads, d_ff = 32, 4, 64
    n_blocks = 2
    final_fc_dim, final_fc_dim2 = 64, 32
    seq_len = 64
    k_index = 3                       # k_index + 1 < L so the sparseattn path is exercised

    key = jax.random.PRNGKey(0)
    kp, kq_, kc, kr, kqs, kcs, krs = jax.random.split(key, 7)
    params = init_params(kp, n_question=n_question, n_pid=n_pid, d_model=d_model,
                         n_blocks=n_blocks, n_heads=n_heads, d_ff=d_ff,
                         final_fc_dim=final_fc_dim, final_fc_dim2=final_fc_dim2,
                         seq_len=seq_len)
    prep = prepare_params(params)     # one-time weight transpose / bf16 cast

    dcur = {
        "qseqs":      jax.random.randint(kq_, (B, S), 0, n_pid),
        "cseqs":      jax.random.randint(kc,  (B, S), 0, n_question),
        "rseqs":      jax.random.randint(kr,  (B, S), 0, 2),
        "shft_qseqs": jax.random.randint(kqs, (B, S), 0, n_pid),
        "shft_cseqs": jax.random.randint(kcs, (B, S), 0, n_question),
        "shft_rseqs": jax.random.randint(krs, (B, S), 0, 2),
    }

    preds, attn_w = sparsekt_forward(prep, dcur, n_heads=n_heads, k_index=k_index)
    preds = jax.block_until_ready(preds)
    attn_w = jax.block_until_ready(attn_w)

    assert preds.shape == (B, S + 1)
    assert attn_w.shape == (B, n_heads, S + 1, S + 1)
    assert bool(jnp.all(jnp.isfinite(preds)))
    assert bool(jnp.all(jnp.isfinite(attn_w)))
    print("KERNEL_OK")
</pallas_src>

<mosaic_0001>
module attributes {stable_mosaic.version = 11 : i64} {
  func.func @_qkv_kernel(%arg0: i32, %arg1: memref<16x32xf32, #tpu.memory_space<vmem>>, %arg2: memref<16x32xf32, #tpu.memory_space<vmem>>, %arg3: memref<32x32xbf16, #tpu.memory_space<vmem>>, %arg4: memref<1x32xf32, #tpu.memory_space<vmem>>, %arg5: memref<32x32xbf16, #tpu.memory_space<vmem>>, %arg6: memref<1x32xf32, #tpu.memory_space<vmem>>, %arg7: memref<16x32xbf16, #tpu.memory_space<vmem>>, %arg8: memref<16x32xbf16, #tpu.memory_space<vmem>>) attributes {dimension_semantics = [#tpu.dimension_semantics<parallel>], iteration_bounds = array<i64: 1>, scalar_prefetch = 0 : i64, scratch_operands = 0 : i64, tpu.core_type = #tpu.core_type<tc>, window_params = [{transform_indices = @transform_0, window_bounds = array<i64: 16, 32>}, {transform_indices = @transform_1, window_bounds = array<i64: 16, 32>}, {pipeline_mode = #tpu.pipeline_mode<synchronous>, transform_indices = @transform_2, window_bounds = array<i64: 32, 32>}, {pipeline_mode = #tpu.pipeline_mode<synchronous>, transform_indices = @transform_3, window_bounds = array<i64: 1, 32>}, {pipeline_mode = #tpu.pipeline_mode<synchronous>, transform_indices = @transform_4, window_bounds = array<i64: 32, 32>}, {pipeline_mode = #tpu.pipeline_mode<synchronous>, transform_indices = @transform_5, window_bounds = array<i64: 1, 32>}, {transform_indices = @transform_6, window_bounds = array<i64: 16, 32>}, {transform_indices = @transform_7, window_bounds = array<i64: 16, 32>}]} {
    %c0 = arith.constant 0 : index
    %c0_0 = arith.constant 0 : index
    %0 = vector.load %arg1[%c0, %c0_0] : memref<16x32xf32, #tpu.memory_space<vmem>>, vector<16x32xf32>
    %1 = arith.truncf %0 : vector<16x32xf32> to vector<16x32xbf16>
    %c0_1 = arith.constant 0 : index
    %c0_2 = arith.constant 0 : index
    %2 = vector.load %arg3[%c0_1, %c0_2] : memref<32x32xbf16, #tpu.memory_space<vmem>>, vector<32x32xbf16>
    %cst = arith.constant dense<0.000000e+00> : vector<16x32xf32>
    %3 = tpu.matmul %1, %2, %cst {dimension_numbers = #tpu.dot_dimension_numbers<[1], [0], [0], [1], [0, 0, 1, 1], [], []>} : vector<16x32xbf16>, vector<32x32xbf16>, vector<16x32xf32> -> vector<16x32xf32>
    %c0_3 = arith.constant 0 : index
    %c0_4 = arith.constant 0 : index
    %4 = vector.load %arg4[%c0_3, %c0_4] : memref<1x32xf32, #tpu.memory_space<vmem>>, vector<1x32xf32>
    %5 = vector.broadcast %4 : vector<1x32xf32> to vector<16x32xf32>
    %6 = arith.addf %3, %5 : vector<16x32xf32>
    %c0_5 = arith.constant 0 : index
    %c0_6 = arith.constant 0 : index
    %7 = vector.load %arg2[%c0_5, %c0_6] : memref<16x32xf32, #tpu.memory_space<vmem>>, vector<16x32xf32>
    %8 = arith.truncf %7 : vector<16x32xf32> to vector<16x32xbf16>
    %c0_7 = arith.constant 0 : index
    %c0_8 = arith.constant 0 : index
    %9 = vector.load %arg5[%c0_7, %c0_8] : memref<32x32xbf16, #tpu.memory_space<vmem>>, vector<32x32xbf16>
    %cst_9 = arith.constant dense<0.000000e+00> : vector<16x32xf32>
    %10 = tpu.matmul %8, %9, %cst_9 {dimension_numbers = #tpu.dot_dimension_numbers<[1], [0], [0], [1], [0, 0, 1, 1], [], []>} : vector<16x32xbf16>, vector<32x32xbf16>, vector<16x32xf32> -> vector<16x32xf32>
    %c0_10 = arith.constant 0 : index
    %c0_11 = arith.constant 0 : index
    %11 = vector.load %arg6[%c0_10, %c0_11] : memref<1x32xf32, #tpu.memory_space<vmem>>, vector<1x32xf32>
    %12 = vector.broadcast %11 : vector<1x32xf32> to vector<16x32xf32>
    %13 = arith.addf %10, %12 : vector<16x32xf32>
    %14 = arith.truncf %6 : vector<16x32xf32> to vector<16x32xbf16>
    %c0_12 = arith.constant 0 : index
    %c0_13 = arith.constant 0 : index
    %15 = vector.load %arg7[%c0_12, %c0_13] : memref<16x32xbf16, #tpu.memory_space<vmem>>, vector<16x32xbf16>
    tpu.vector_store %arg7[%c0_12, %c0_13], %14 {strides = array<i32>} : memref<16x32xbf16, #tpu.memory_space<vmem>>, vector<16x32xbf16>,
    %16 = arith.truncf %13 : vector<16x32xf32> to vector<16x32xbf16>
    %c0_14 = arith.constant 0 : index
    %c0_15 = arith.constant 0 : index
    %17 = vector.load %arg8[%c0_14, %c0_15] : memref<16x32xbf16, #tpu.memory_space<vmem>>, vector<16x32xbf16>
    tpu.vector_store %arg8[%c0_14, %c0_15], %16 {strides = array<i32>} : memref<16x32xbf16, #tpu.memory_space<vmem>>, vector<16x32xbf16>,
    return
  }
  func.func @transform_0(%arg0: i32) -> (i32, i32) {
    %c0_i32 = arith.constant 0 : i32
    %c0_i32_0 = arith.constant 0 : i32
    return %arg0, %c0_i32 : i32, i32
  }
  func.func @transform_1(%arg0: i32) -> (i32, i32) {
    %c0_i32 = arith.constant 0 : i32
    %c0_i32_0 = arith.constant 0 : i32
    return %arg0, %c0_i32 : i32, i32
  }
  func.func @transform_2(%arg0: i32) -> (i32, i32) {
    %c0_i32 = arith.constant 0 : i32
    %c0_i32_0 = arith.constant 0 : i32
    %c0_i32_1 = arith.constant 0 : i32
    return %c0_i32, %c0_i32_0 : i32, i32
  }
  func.func @transform_3(%arg0: i32) -> (i32, i32) {
    %c0_i32 = arith.constant 0 : i32
    %c0_i32_0 = arith.constant 0 : i32
    %c0_i32_1 = arith.constant 0 : i32
    return %c0_i32, %c0_i32_0 : i32, i32
  }
  func.func @transform_4(%arg0: i32) -> (i32, i32) {
    %c0_i32 = arith.constant 0 : i32
    %c0_i32_0 = arith.constant 0 : i32
    %c0_i32_1 = arith.constant 0 : i32
    return %c0_i32, %c0_i32_0 : i32, i32
  }
  func.func @transform_5(%arg0: i32) -> (i32, i32) {
    %c0_i32 = arith.constant 0 : i32
    %c0_i32_0 = arith.constant 0 : i32
    %c0_i32_1 = arith.constant 0 : i32
    return %c0_i32, %c0_i32_0 : i32, i32
  }
  func.func @transform_6(%arg0: i32) -> (i32, i32) {
    %c0_i32 = arith.constant 0 : i32
    %c0_i32_0 = arith.constant 0 : i32
    return %arg0, %c0_i32 : i32, i32
  }
  func.func @transform_7(%arg0: i32) -> (i32, i32) {
    %c0_i32 = arith.constant 0 : i32
    %c0_i32_0 = arith.constant 0 : i32
    return %arg0, %c0_i32 : i32, i32
  }
}

</mosaic_0001>

<bundles_post_ra>
// kernel: tpu_custom_call.1
= control target key start
LH: loop header
LB: loop body
LE: loop exit
PB: predicated region body
PF: predicated region fallthrough
CT: control target
= control target key end

     0   :  { %13 = vsyncpa [#allocation3], 0  ;;  %s556_s0 = inlined_call_operand.hbm [shape: f32[16,32], index: 0, kind: input, shape index: {}]   ;;  %s557_s1 = inlined_call_operand.hbm [shape: f32[16,32], index: 1, kind: input, shape index: {}]   ;;  %s558_s2 = inlined_call_operand.hbm [shape: bf16[32,32], index: 2, kind: input, shape index: {}]   ;;  %s559_s3 = inlined_call_operand.vmem [shape: f32[1,32], index: 3, kind: input, shape index: {}]   ;;  %s560_s4 = inlined_call_operand.hbm [shape: bf16[32,32], index: 4, kind: input, shape index: {}]   ;;  %s561_s5 = inlined_call_operand.vmem [shape: f32[1,32], index: 5, kind: input, shape index: {}]   ;;  %s562_s6 = inlined_call_operand.hbm [shape: bf16[16,32], index: 6, kind: output, shape index: {0}]   ;;  %s563_s7 = inlined_call_operand.hbm [shape: bf16[16,32], index: 7, kind: output, shape index: {1}]  }
   0x1   :  { %14 = vsyncpa [#allocation6], 0 }
   0x2   :  { %15 = vsyncpa [#allocation9], 0 }
   0x3   :  { %16 = vsyncpa [#allocation4], 0 }
   0x4   :  { %17 = vsyncpa [#allocation12], 0  ;;  %s464_s24 = smov [#allocation5]   ;;  %s465_s26 = smov [#allocation2]  }
   0x5   :  { %s35_s25 = sshll.u32 %s464_s24, 4  ;;  %s23_s27 = sshll.u32 %s465_s26, 4  ;;  %s36_s25 = int_to_ptr.vmem [resolvable:$true] %s35_s25  ;;  %s24_s27 = int_to_ptr.vmem [resolvable:$true] %s23_s27 }
   0x6   :  { %s342_s28 = scalar_lea.vmem %s36_s25, 256  ;;  %p347_p1 = scmp.lt.s32.totalorder %s36_s25, %s36_s25 }
   0x7   :  { %p343_p0 = scmp.ne.s32.totalorder %s36_s25, %s342_s28  ;;  %p348_p2 = scmp.lt.s32.totalorder %s342_s28, %s342_s28 }
   0x9   :  { %p349_p3 = por %p348_p2, %p347_p1 }
   0xb   :  { %p350_p4 = pnand %p349_p3, %p343_p0 }
   0xd   :  { %353 = shalt.err (!%p350_p4)
}
   0xe   :  { %s466_s29 = smov 128   ;;  %s467_s30 = smov 8  }
   0xf   :  { %41 = dma.hbm_to_vmem [thread:$0]  %s557_s1, 256, %s36_s25, [#allocation6], %s466_s29, %s466_s29, %s467_s30  }
  0x10   :  { %s362_s10 = scalar_lea.vmem %s24_s27, 256  ;;  %p367_p6 = scmp.lt.s32.totalorder %s24_s27, %s24_s27 }
  0x11   :  { %p363_p5 = scmp.ne.s32.totalorder %s24_s27, %s362_s10  ;;  %p368_p7 = scmp.lt.s32.totalorder %s362_s10, %s362_s10 }
  0x13   :  { %p369_p8 = por %p368_p7, %p367_p6 }
  0x15   :  { %p370_p9 = pnand %p369_p8, %p363_p5 }
  0x17   :  { %373 = shalt.err (!%p370_p9)
}
  0x18   :  { %29 = dma.hbm_to_vmem [thread:$0]  %s556_s0, 256, %s24_s27, [#allocation3], %s466_s29, %s466_s29, %s467_s30  }
  0x19   :  { %s468_s13 = smov [#allocation7]  }
  0x1a   :  { %s47_s14 = sshll.u32 %s468_s13, 4  ;;  %s48_s14 = int_to_ptr.vmem [resolvable:$true] %s47_s14 }
  0x1b   :  { %s382_s15 = scalar_lea.vmem %s48_s14, 256  ;;  %p387_p11 = scmp.lt.s32.totalorder %s48_s14, %s48_s14 }
  0x1c   :  { %p383_p10 = scmp.ne.s32.totalorder %s48_s14, %s382_s15  ;;  %p388_p12 = scmp.lt.s32.totalorder %s382_s15, %s382_s15 }
  0x1e   :  { %p389_p13 = por %p388_p12, %p387_p11 }
  0x20   :  { %p390_p0 = pnand %p389_p13, %p383_p10 }
  0x22   :  { %393 = shalt.err (!%p390_p0)
}
  0x23   :  { %s469_s1 = smov 64   ;;  %s470_s16 = smov 4  }
  0x24   :  { %53 = dma.hbm_to_vmem [thread:$0]  %s558_s2, 256, %s48_s14, [#allocation6], %s469_s1, %s469_s1, %s470_s16  }
  0x25   :  { %s471_s0 = smov [#allocation8]  }
  0x26   :  { %s61_s19 = sshll.u32 %s471_s0, 4  ;;  %s62_s19 = int_to_ptr.vmem [resolvable:$true] %s61_s19 }
  0x27   :  { %s402_s20 = scalar_lea.vmem %s62_s19, 256  ;;  %p407_p2 = scmp.lt.s32.totalorder %s62_s19, %s62_s19 }
  0x28   :  { %p403_p1 = scmp.ne.s32.totalorder %s62_s19, %s402_s20  ;;  %p408_p3 = scmp.lt.s32.totalorder %s402_s20, %s402_s20 }
  0x2a   :  { %p409_p4 = por %p408_p3, %p407_p2 }
  0x2c   :  { %p410_p5 = pnand %p409_p4, %p403_p1 }
  0x2e   :  { %413 = shalt.err (!%p410_p5)
}
  0x2f   :  { %67 = dma.hbm_to_vmem [thread:$0]  %s560_s4, 256, %s62_s19, [#allocation9], %s469_s1, %s469_s1, %s470_s16  }
  0x30   :  { %454 = dma.done.wait [#allocation3], 256  }
  0x31   :  { %455 = vsyncadd [#allocation3], 4294967040 }
  0x32   :  { %456 = dma.done.wait [#allocation6], 512  }
  0x33   :  { %457 = vsyncadd [#allocation6], 4294966784 }
  0x34   :  { %458 = dma.done.wait [#allocation9], 256  }
  0x35   :  { %459 = vsyncadd [#allocation9], 4294967040  ;;  %v472_v0 = vmov 0.0   ;;  %vm473_vm0 = vmmov 0   ;;  %v330_v1 = vld [vmem:[#allocation7 + $0x8] sm:$0xff]   ;;  %v331_v2 = vld [vmem:[#allocation8 + $0x8] sm:$0xff]  }
  0x36   :  { %302 = vmatprep.subr.bf16.mxu0 %v472_v0  ;;  %310 = vmatprep.subr.bf16.mxu1 %v472_v0  ;;  %v332_v3 = vld [vmem:[#allocation7] sm:$0xff]   ;;  %v333_v4 = vld [vmem:[#allocation8] sm:$0xff]   ;;  %v84_v6 = vld [vmem:[#allocation2 + $0x8] sm:$0xff]  ;;  %vm109_vm1 = vcmask 261120   ;;  %vm232_vm2 = vcmask 257024   ;;  %s474_s25 = smov [#allocation10]  }
  0x37   :  { %306 = vmatprep.mubr.msk.bf16.mxu0 %vm473_vm0, %v472_v0  ;;  %314 = vmatprep.mubr.msk.bf16.mxu1 %vm473_vm0, %v472_v0  ;;  %v83_v5 = vld [vmem:[#allocation2] sm:$0xff]  ;;  %v154_v7 = vld [vmem:[#allocation5] sm:$0xff]  ;;  %v155_v9 = vld [vmem:[#allocation5 + $0x8] sm:$0xff]  ;;  %s250_s26 = sshll.u32 %s474_s25, 4  ;;  %s251_s26 = int_to_ptr.vmem [resolvable:$true] %s250_s26 }
  0x38   :  { %303 = vmatpush3.bf16.msra.mxu0 %v330_v1  ;;  %311 = vmatpush3.bf16.msra.mxu1 %v331_v2  ;;  %v85_v8 = vpack.c.bf16 %v84_v6, %v83_v5  ;;  %v156_v10 = vpack.c.bf16 %v155_v9, %v154_v7  ;;  %v280_v11 = vld [vmem:[%s559_s3] ss:$0 sm:$0xff]  ;;  %s475_s3 = smov [#allocation11]   ;;  %p419_p7 = scmp.lt.s32.totalorder %s251_s26, %s251_s26 }
  0x39   :  { %304 = vmatprep.subr.bf16.mxu0 %v472_v0  ;;  %312 = vmatprep.subr.bf16.mxu1 %v472_v0  ;;  %v284_v12 = vld [vmem:[%s561_s5] ss:$0 sm:$0xff]  ;;  %s262_s27 = sshll.u32 %s475_s3, 4  ;;  %s414_s5 = scalar_lea.vmem %s251_s26, 128  ;;  %s263_s27 = int_to_ptr.vmem [resolvable:$true] %s262_s27 }
  0x3a   :  { %p415_p6 = scmp.ne.s32.totalorder %s251_s26, %s414_s5  ;;  %p420_p8 = scmp.lt.s32.totalorder %s414_s5, %s414_s5 }
  0x3c   :  { %305 = vmatpush3.bf16.msra.mxu0 %v332_v3  ;;  %313 = vmatpush3.bf16.msra.mxu1 %v333_v4  ;;  %p421_p9 = por %p420_p8, %p419_p7 }
  0x3e   :  { %p422_p10 = pnand %p421_p9, %p415_p6 }
  0x3f   :  { %307 = vmatmul.mubr.msk.bf16.vlgmr.msra.gmra.mxu0 %vm109_vm1, %v85_v8  ;;  %315 = vmatmul.mubr.msk.bf16.vlgmr.msra.gmra.mxu1 %vm109_vm1, %v156_v10 }
  0xff   :  { %v147_v13 = vpop.f32.mrf.mxu0  ;;  %v217_v15 = vpop.f32.mrf.mxu1 }
 0x100   :  { %v148_v14 = vadd.f32 %v280_v11, %v147_v13  ;;  %v218_v16 = vadd.f32 %v284_v12, %v217_v15 }
 0x101   :  { %v308_v17 = vpop.f32.mrf.mxu0  ;;  %v316_v19 = vpop.f32.mrf.mxu1 }
 0x102   :  { %v292_v18 = vpack.c.bf16 %v148_v14, %v148_v14  ;;  %v294_v20 = vpack.c.bf16 %v218_v16, %v218_v16 }
 0x103   :  { %v150_v21 = vpop.f32.mrf.mxu0  ;;  %v220_v23 = vpop.f32.mrf.mxu1 }
 0x104   :  { %v151_v22 = vadd.f32 %v280_v11, %v150_v21  ;;  %233 = vst.msk [vmem:[#allocation10] sm:$0xf] %vm232_vm2, %v292_v18  ;;  %v221_v24 = vadd.f32 %v284_v12, %v220_v23  ;;  %243 = vst.msk [vmem:[#allocation11] sm:$0xf] %vm232_vm2, %v294_v20 }
 0x105   :  { %v309_v25 = vpop.f32.mrf.mxu0  ;;  %v317_v27 = vpop.f32.mrf.mxu1 }
 0x106   :  { %v293_v26 = vpack.c.bf16 %v151_v22, %v151_v22  ;;  %v295_v28 = vpack.c.bf16 %v221_v24, %v221_v24 }
 0x108   :  { %234 = vst.msk [vmem:[#allocation10 + $0x4] sm:$0xf] %vm232_vm2, %v293_v26 }
 0x109   :  { %425 = shalt.err (!%p422_p10)
}
 0x10a   :  { %256 = dma.vmem_to_hbm [thread:$0]  %s251_s26, 128, %s562_s6, [#allocation4], %s469_s1, %s469_s1, %s470_s16   ;;  %244 = vst.msk [vmem:[#allocation11 + $0x4] sm:$0xf] %vm232_vm2, %v295_v28 }
 0x10b   :  { %s434_s30 = scalar_lea.vmem %s263_s27, 128  ;;  %p439_p12 = scmp.lt.s32.totalorder %s263_s27, %s263_s27 }
 0x10c   :  { %p435_p11 = scmp.ne.s32.totalorder %s263_s27, %s434_s30  ;;  %p440_p13 = scmp.lt.s32.totalorder %s434_s30, %s434_s30 }
 0x10e   :  { %p441_p0 = por %p440_p13, %p439_p12 }
 0x110   :  { %p442_p1 = pnand %p441_p0, %p435_p11 }
 0x112   :  { %445 = shalt.err (!%p442_p1)
}
 0x113   :  { %268 = dma.vmem_to_hbm [thread:$0]  %s263_s27, 128, %s563_s7, [#allocation12], %s469_s1, %s469_s1, %s470_s16  }
 0x114   :  { %460 = dma.done.wait [#allocation4], 128  }
 0x115   :  { %461 = vsyncadd [#allocation4], 4294967168 }
 0x116   :  { %462 = dma.done.wait [#allocation12], 128  }
 0x117   :  { %463 = vsyncadd [#allocation12], 4294967168 }
 0x118   :  { %275 = vsyncpa [#allocation3], 1 }
 0x119   :  { %276 = vsyncpa [#allocation6], 1 }
 0x11a   :  { %277 = vsyncpa [#allocation9], 1 }
 0x11b   :  { %278 = vsyncpa [#allocation4], 1 }
 0x11c   :  { %279 = vsyncpa [#allocation12], 1 }

</bundles_post_ra>
